<compile_context>
chip_gen: v6e
topology: v6e:2x2x1
jax: 0.10.0
libtpu: 0.0.40
codegen_flags: <defaults>
</compile_context>

<pallas_src>
import jax
import jax.numpy as jnp
from jax.experimental import pallas as pl
from jax.experimental.pallas import tpu as pltpu


def _round_up(n, m):
    return ((n + m - 1) // m) * m


def _mlp_kernel(x_ref, w1_ref, b1_ref, w2_ref, b2_ref, o_ref):
    # layer1: Linear(784, 256) — bf16 operands on the MXU, f32 accumulation.
    h = jnp.dot(x_ref[...], w1_ref[...], preferred_element_type=jnp.float32)
    h = h + b1_ref[...]                      # (1, 256) f32 bias, broadcasts over rows
    # layer2: ReLU (f32 VPU)
    h = jnp.maximum(h, 0.0)
    # layer3: Linear(256, 10), padded to 128 output lanes -> unmasked stores.
    out = jnp.dot(h.astype(w2_ref.dtype), w2_ref[...],
                  preferred_element_type=jnp.float32)
    o_ref[...] = out + b2_ref[...]           # (1, 128) f32 bias


def my_module_dict_forward(x, w1, b1, w2, b2):
    """x: (B, 784) f32; w1: (784, 256); b1: (256,); w2: (256, 10); b2: (10,)."""
    B = x.shape[0]
    IN, HID = w1.shape
    OUT = w2.shape[1]
    N_PAD = 128                               # lane-dense output width

    # bf16 weights/activations halve the dominant HBM traffic; pad w2/b2 to 128 lanes.
    x_bf = x.astype(jnp.bfloat16)
    w1_bf = w1.astype(jnp.bfloat16)
    w2_bf = jnp.zeros((HID, N_PAD), jnp.bfloat16).at[:, :OUT].set(
        w2.astype(jnp.bfloat16))
    b1_f = b1.reshape(1, HID).astype(jnp.float32)
    b2_f = jnp.zeros((1, N_PAD), jnp.float32).at[:, :OUT].set(
        b2.reshape(1, OUT).astype(jnp.float32))

    # Batch tiling: TB = 128 for real batches (fills the MXU's M dim), otherwise the
    # batch rounded up to a multiple of 8 (sublane granularity).
    TB = min(128, _round_up(B, 8))
    B_pad = _round_up(B, TB)
    if B_pad != B:
        x_bf = jnp.pad(x_bf, ((0, B_pad - B), (0, 0)))

    out_padded = pl.pallas_call(
        _mlp_kernel,
        out_shape=jax.ShapeDtypeStruct((B_pad, N_PAD), jnp.float32),
        grid=(B_pad // TB,),
        in_specs=[
            pl.BlockSpec((TB, IN), lambda i: (i, 0)),      # x tile, pipelined
            pl.BlockSpec((IN, HID), lambda i: (0, 0)),     # w1 resident across tiles
            pl.BlockSpec((1, HID), lambda i: (0, 0)),      # b1 resident
            pl.BlockSpec((HID, N_PAD), lambda i: (0, 0)),  # w2 (padded) resident
            pl.BlockSpec((1, N_PAD), lambda i: (0, 0)),    # b2 (padded) resident
        ],
        out_specs=pl.BlockSpec((TB, N_PAD), lambda i: (i, 0)),
        compiler_params=pltpu.CompilerParams(
            dimension_semantics=("parallel",)),            # shards batch on v7x's 2 TCs
    )(x_bf, w1_bf, b1_f, w2_bf, b2_f)

    return out_padded[:B, :OUT]


def _torch_linear_init(key, in_features, out_features):
    """Deterministic init mimicking torch.nn.Linear defaults:
    W, b ~ U(-1/sqrt(in), 1/sqrt(in)). Weight returned as (in, out) so y = x @ W + b."""
    kw, kb = jax.random.split(key)
    bound = 1.0 / jnp.sqrt(jnp.float32(in_features))
    w = jax.random.uniform(kw, (in_features, out_features), jnp.float32,
                           minval=-bound, maxval=bound)
    b = jax.random.uniform(kb, (out_features,), jnp.float32,
                           minval=-bound, maxval=bound)
    return w, b


def _reference(x, w1, b1, w2, b2):
    # f32 reference using the same bf16-rounded operands the kernel consumes.
    xb = x.astype(jnp.bfloat16).astype(jnp.float32)
    w1b = w1.astype(jnp.bfloat16).astype(jnp.float32)
    w2b = w2.astype(jnp.bfloat16).astype(jnp.float32)
    h = jnp.maximum(xb @ w1b + b1.reshape(1, -1), 0.0)
    hb = h.astype(jnp.bfloat16).astype(jnp.float32)
    return hb @ w2b + b2.reshape(1, -1)


if __name__ == "__main__":
    key = jax.random.PRNGKey(0)
    k_x, k_l1, k_l3 = jax.random.split(key, 3)

    B = 8
    x = jax.random.normal(k_x, (B, 784), jnp.float32)

    w1, b1 = _torch_linear_init(k_l1, 784, 256)   # layer1: Linear(784, 256)
    w2, b2 = _torch_linear_init(k_l3, 256, 10)    # layer3: Linear(256, 10)

    out = my_module_dict_forward(x, w1, b1, w2, b2)
    out = jax.block_until_ready(out)

    ref = _reference(x, w1, b1, w2, b2)
    assert out.shape == (B, 10)
    assert jnp.allclose(out, ref, atol=2e-3, rtol=2e-3), "mismatch vs reference"

    print("KERNEL_OK")
</pallas_src>

<mosaic_0001>
module attributes {stable_mosaic.version = 11 : i64} {
  func.func @_mlp_kernel(%arg0: i32, %arg1: memref<8x784xbf16, #tpu.memory_space<vmem>>, %arg2: memref<784x256xbf16, #tpu.memory_space<vmem>>, %arg3: memref<1x256xf32, #tpu.memory_space<vmem>>, %arg4: memref<256x128xbf16, #tpu.memory_space<vmem>>, %arg5: memref<1x128xf32, #tpu.memory_space<vmem>>, %arg6: memref<8x128xf32, #tpu.memory_space<vmem>>) attributes {dimension_semantics = [#tpu.dimension_semantics<parallel>], iteration_bounds = array<i64: 1>, scalar_prefetch = 0 : i64, scratch_operands = 0 : i64, tpu.core_type = #tpu.core_type<tc>, window_params = [{transform_indices = @transform_0, window_bounds = array<i64: 8, 784>}, {pipeline_mode = #tpu.pipeline_mode<synchronous>, transform_indices = @transform_1, window_bounds = array<i64: 784, 256>}, {pipeline_mode = #tpu.pipeline_mode<synchronous>, transform_indices = @transform_2, window_bounds = array<i64: 1, 256>}, {pipeline_mode = #tpu.pipeline_mode<synchronous>, transform_indices = @transform_3, window_bounds = array<i64: 256, 128>}, {pipeline_mode = #tpu.pipeline_mode<synchronous>, transform_indices = @transform_4, window_bounds = array<i64: 1, 128>}, {transform_indices = @transform_5, window_bounds = array<i64: 8, 128>}]} {
    %c0 = arith.constant 0 : index
    %c0_0 = arith.constant 0 : index
    %0 = vector.load %arg1[%c0, %c0_0] : memref<8x784xbf16, #tpu.memory_space<vmem>>, vector<8x784xbf16>
    %c0_1 = arith.constant 0 : index
    %c0_2 = arith.constant 0 : index
    %1 = vector.load %arg2[%c0_1, %c0_2] : memref<784x256xbf16, #tpu.memory_space<vmem>>, vector<784x256xbf16>
    %cst = arith.constant dense<0.000000e+00> : vector<8x256xf32>
    %2 = tpu.matmul %0, %1, %cst {dimension_numbers = #tpu.dot_dimension_numbers<[1], [0], [0], [1], [0, 0, 1, 1], [], []>} : vector<8x784xbf16>, vector<784x256xbf16>, vector<8x256xf32> -> vector<8x256xf32>
    %c0_3 = arith.constant 0 : index
    %c0_4 = arith.constant 0 : index
    %3 = vector.load %arg3[%c0_3, %c0_4] : memref<1x256xf32, #tpu.memory_space<vmem>>, vector<1x256xf32>
    %4 = vector.broadcast %3 : vector<1x256xf32> to vector<8x256xf32>
    %5 = arith.addf %2, %4 : vector<8x256xf32>
    %cst_5 = arith.constant 0.000000e+00 : f32
    %6 = vector.broadcast %cst_5 : f32 to vector<8x256xf32>
    %7 = arith.maximumf %5, %6 : vector<8x256xf32>
    %8 = arith.truncf %7 : vector<8x256xf32> to vector<8x256xbf16>
    %c0_6 = arith.constant 0 : index
    %c0_7 = arith.constant 0 : index
    %9 = vector.load %arg4[%c0_6, %c0_7] : memref<256x128xbf16, #tpu.memory_space<vmem>>, vector<256x128xbf16>
    %cst_8 = arith.constant dense<0.000000e+00> : vector<8x128xf32>
    %10 = tpu.matmul %8, %9, %cst_8 {dimension_numbers = #tpu.dot_dimension_numbers<[1], [0], [0], [1], [0, 0, 1, 1], [], []>} : vector<8x256xbf16>, vector<256x128xbf16>, vector<8x128xf32> -> vector<8x128xf32>
    %c0_9 = arith.constant 0 : index
    %c0_10 = arith.constant 0 : index
    %11 = vector.load %arg5[%c0_9, %c0_10] : memref<1x128xf32, #tpu.memory_space<vmem>>, vector<1x128xf32>
    %12 = vector.broadcast %11 : vector<1x128xf32> to vector<8x128xf32>
    %13 = arith.addf %10, %12 : vector<8x128xf32>
    %c0_11 = arith.constant 0 : index
    %c0_12 = arith.constant 0 : index
    %14 = vector.load %arg6[%c0_11, %c0_12] : memref<8x128xf32, #tpu.memory_space<vmem>>, vector<8x128xf32>
    tpu.vector_store %arg6[%c0_11, %c0_12], %13 {strides = array<i32>} : memref<8x128xf32, #tpu.memory_space<vmem>>, vector<8x128xf32>,
    return
  }
  func.func @transform_0(%arg0: i32) -> (i32, i32) {
    %c0_i32 = arith.constant 0 : i32
    %c0_i32_0 = arith.constant 0 : i32
    return %arg0, %c0_i32 : i32, i32
  }
  func.func @transform_1(%arg0: i32) -> (i32, i32) {
    %c0_i32 = arith.constant 0 : i32
    %c0_i32_0 = arith.constant 0 : i32
    %c0_i32_1 = arith.constant 0 : i32
    return %c0_i32, %c0_i32_0 : i32, i32
  }
  func.func @transform_2(%arg0: i32) -> (i32, i32) {
    %c0_i32 = arith.constant 0 : i32
    %c0_i32_0 = arith.constant 0 : i32
    %c0_i32_1 = arith.constant 0 : i32
    return %c0_i32, %c0_i32_0 : i32, i32
  }
  func.func @transform_3(%arg0: i32) -> (i32, i32) {
    %c0_i32 = arith.constant 0 : i32
    %c0_i32_0 = arith.constant 0 : i32
    %c0_i32_1 = arith.constant 0 : i32
    return %c0_i32, %c0_i32_0 : i32, i32
  }
  func.func @transform_4(%arg0: i32) -> (i32, i32) {
    %c0_i32 = arith.constant 0 : i32
    %c0_i32_0 = arith.constant 0 : i32
    %c0_i32_1 = arith.constant 0 : i32
    return %c0_i32, %c0_i32_0 : i32, i32
  }
  func.func @transform_5(%arg0: i32) -> (i32, i32) {
    %c0_i32 = arith.constant 0 : i32
    %c0_i32_0 = arith.constant 0 : i32
    return %arg0, %c0_i32 : i32, i32
  }
}

</mosaic_0001>

<bundles_post_ra>
// kernel: tpu_custom_call.1
= control target key start
LH: loop header
LB: loop body
LE: loop exit
PB: predicated region body
PF: predicated region fallthrough
CT: control target
= control target key end

     0   :  { %10 = vsyncpa [#allocation3], 0  ;;  %s1527_s0 = inlined_call_operand.hbm [shape: bf16[8,784], index: 0, kind: input, shape index: {}]   ;;  %s1528_s1 = inlined_call_operand.hbm [shape: bf16[784,256], index: 1, kind: input, shape index: {}]   ;;  %s1529_s2 = inlined_call_operand.vmem [shape: f32[1,256], index: 2, kind: input, shape index: {}]   ;;  %s1530_s3 = inlined_call_operand.hbm [shape: bf16[256,128], index: 3, kind: input, shape index: {}]   ;;  %s1531_s4 = inlined_call_operand.vmem [shape: f32[1,128], index: 4, kind: input, shape index: {}]   ;;  %s1532_s5 = inlined_call_operand.hbm [shape: f32[8,128], index: 5, kind: output, shape index: {}]  }
   0x1   :  { %11 = vsyncpa [#allocation6], 0 }
   0x2   :  { %12 = vsyncpa [#allocation4], 0  ;;  %s1463_s18 = smov [#allocation5]  }
   0x3   :  { %s28_s19 = sshll.u32 %s1463_s18, 4  ;;  %s29_s19 = int_to_ptr.vmem [resolvable:$true] %s28_s19 }
   0x4   :  { %s1385_s20 = scalar_lea.vmem %s29_s19, 12544  ;;  %p1390_p1 = scmp.lt.s32.totalorder %s29_s19, %s29_s19 }
   0x5   :  { %p1386_p0 = scmp.ne.s32.totalorder %s29_s19, %s1385_s20  ;;  %p1391_p2 = scmp.lt.s32.totalorder %s1385_s20, %s1385_s20 }
   0x7   :  { %p1392_p3 = por %p1391_p2, %p1390_p1 }
   0x9   :  { %p1393_p4 = pnand %p1392_p3, %p1386_p0 }
   0xb   :  { %1396 = shalt.err (!%p1393_p4)
}
   0xc   :  { %s1464_s21 = smov 128   ;;  %s1465_s22 = smov 8  }
   0xd   :  { %34 = dma.hbm_to_vmem [thread:$0]  %s1528_s1, 12544, %s29_s19, [#allocation6], %s1464_s21, %s1464_s21, %s1465_s22  }
   0xe   :  { %s1466_s25 = smov [#allocation2]   ;;  %s1467_s27 = smov [#allocation7]  }
   0xf   :  { %s19_s26 = sshll.u32 %s1466_s25, 4  ;;  %s42_s28 = sshll.u32 %s1467_s27, 4  ;;  %s20_s26 = int_to_ptr.vmem [resolvable:$true] %s19_s26  ;;  %s43_s28 = int_to_ptr.vmem [resolvable:$true] %s42_s28 }
  0x10   :  { %s1405_s29 = scalar_lea.vmem %s20_s26, 448  ;;  %p1410_p6 = scmp.lt.s32.totalorder %s20_s26, %s20_s26 }
  0x11   :  { %p1406_p5 = scmp.ne.s32.totalorder %s20_s26, %s1405_s29  ;;  %p1411_p7 = scmp.lt.s32.totalorder %s1405_s29, %s1405_s29 }
  0x13   :  { %p1412_p8 = por %p1411_p7, %p1410_p6 }
  0x15   :  { %p1413_p9 = pnand %p1412_p8, %p1406_p5 }
  0x17   :  { %1416 = shalt.err (!%p1413_p9)
}
  0x18   :  { %22 = dma.hbm_to_vmem [thread:$0]  %s1527_s0, 448, %s20_s26, [#allocation3]  }
  0x19   :  { %s1425_s7 = scalar_lea.vmem %s43_s28, 2048  ;;  %p1430_p11 = scmp.lt.s32.totalorder %s43_s28, %s43_s28 }
  0x1a   :  { %p1426_p10 = scmp.ne.s32.totalorder %s43_s28, %s1425_s7  ;;  %p1431_p12 = scmp.lt.s32.totalorder %s1425_s7, %s1425_s7 }
  0x1c   :  { %p1432_p13 = por %p1431_p12, %p1430_p11 }
  0x1e   :  { %p1433_p0 = pnand %p1432_p13, %p1426_p10 }
  0x20   :  { %1436 = shalt.err (!%p1433_p0)
}
  0x21   :  { %s1468_s1 = smov 64   ;;  %s1469_s8 = smov 4  }
  0x22   :  { %48 = dma.hbm_to_vmem [thread:$0]  %s1530_s3, 2048, %s43_s28, [#allocation6], %s1468_s1, %s1468_s1, %s1469_s8  }
  0x23   :  { %1457 = dma.done.wait [#allocation3], 448  }
  0x24   :  { %1458 = vsyncadd [#allocation3], 4294966848 }
  0x25   :  { %1459 = dma.done.wait [#allocation6], 14592  }
  0x26   :  { %1460 = vsyncadd [#allocation6], 4294952704  ;;  %v1207_v0 = vld [vmem:[#allocation5 + $0x74] ss:$8 sps:$4 sm:$0xff]   ;;  %v1209_v1 = vld [vmem:[#allocation5 + $0x70] ss:$8 sps:$4 sm:$0xff]  }
  0x27   :  { %693 = vmatprep.subr.bf16.mxu0 %v1207_v0  ;;  %v1210_v2 = vld [vmem:[#allocation5 + $0x174] ss:$8 sps:$4 sm:$0xff]   ;;  %v1212_v3 = vld [vmem:[#allocation5 + $0x170] ss:$8 sps:$4 sm:$0xff]   ;;  %v1213_v4 = vld [vmem:[#allocation5 + $0x64] ss:$8 sps:$4 sm:$0xff]  }
  0x28   :  { %694 = vmatpush1.bf16.msra.mxu0 %v1209_v1  ;;  %v1215_v5 = vld [vmem:[#allocation5 + $0x60] ss:$8 sps:$4 sm:$0xff]   ;;  %734 = vmatprep.subr.bf16.mxu1 %v1210_v2  ;;  %v1216_v6 = vld [vmem:[#allocation5 + $0x164] ss:$8 sps:$4 sm:$0xff]   ;;  %v1219_v8 = vld [vmem:[#allocation5 + $0x54] ss:$8 sps:$4 sm:$0xff]  }
  0x29   :  { %735 = vmatpush1.bf16.msra.mxu1 %v1212_v3  ;;  %695 = vmatprep.subr.bf16.mxu0 %v1213_v4  ;;  %v1218_v7 = vld [vmem:[#allocation5 + $0x160] ss:$8 sps:$4 sm:$0xff]   ;;  %v1221_v9 = vld [vmem:[#allocation5 + $0x50] ss:$8 sps:$4 sm:$0xff]   ;;  %v1222_v10 = vld [vmem:[#allocation5 + $0x154] ss:$8 sps:$4 sm:$0xff]  }
  0x2a   :  { %736 = vmatprep.subr.bf16.mxu1 %v1216_v6  ;;  %v1225_v11 = vld [vmem:[#allocation5 + $0x44] ss:$8 sps:$4 sm:$0xff]   ;;  %v1224_v12 = vld [vmem:[#allocation5 + $0x150] ss:$8 sps:$4 sm:$0xff]   ;;  %v1227_v14 = vld [vmem:[#allocation5 + $0x40] ss:$8 sps:$4 sm:$0xff]  }
  0x2b   :  { %v1228_v13 = vld [vmem:[#allocation5 + $0x144] ss:$8 sps:$4 sm:$0xff]   ;;  %v1231_v15 = vld [vmem:[#allocation5 + $0x34] ss:$8 sps:$4 sm:$0xff]   ;;  %v1230_v16 = vld [vmem:[#allocation5 + $0x140] ss:$8 sps:$4 sm:$0xff]  }
  0x2c   :  { %696 = vmatpush1.bf16.msra.mxu0 %v1215_v5  ;;  %v1234_v17 = vld [vmem:[#allocation5 + $0x134] ss:$8 sps:$4 sm:$0xff]   ;;  %v1233_v18 = vld [vmem:[#allocation5 + $0x30] ss:$8 sps:$4 sm:$0xff]   ;;  %v1237_v19 = vld [vmem:[#allocation5 + $0x24] ss:$8 sps:$4 sm:$0xff]  }
  0x2d   :  { %697 = vmatprep.subr.bf16.mxu0 %v1219_v8  ;;  %737 = vmatpush1.bf16.msra.mxu1 %v1218_v7  ;;  %v1236_v20 = vld [vmem:[#allocation5 + $0x130] ss:$8 sps:$4 sm:$0xff]   ;;  %v1240_v21 = vld [vmem:[#allocation5 + $0x124] ss:$8 sps:$4 sm:$0xff]   ;;  %v1239_v22 = vld [vmem:[#allocation5 + $0x20] ss:$8 sps:$4 sm:$0xff]  }
  0x2e   :  { %738 = vmatprep.subr.bf16.mxu1 %v1222_v10  ;;  %v1243_v23 = vld [vmem:[#allocation5 + $0x14] ss:$8 sps:$4 sm:$0xff]   ;;  %v1242_v24 = vld [vmem:[#allocation5 + $0x120] ss:$8 sps:$4 sm:$0xff]   ;;  %v1245_v26 = vld [vmem:[#allocation5 + $0x10] ss:$8 sps:$4 sm:$0xff]  }
  0x2f   :  { %v1246_v25 = vld [vmem:[#allocation5 + $0x114] ss:$8 sps:$4 sm:$0xff]   ;;  %v1249_v27 = vld [vmem:[#allocation5 + $0x4] ss:$8 sps:$4 sm:$0xff]   ;;  %v1248_v28 = vld [vmem:[#allocation5 + $0x110] ss:$8 sps:$4 sm:$0xff]  }
  0x30   :  { %698 = vmatpush1.bf16.msra.mxu0 %v1221_v9  ;;  %v1252_v29 = vld [vmem:[#allocation5 + $0x104] ss:$8 sps:$4 sm:$0xff]   ;;  %v1251_v30 = vld [vmem:[#allocation5] ss:$8 sps:$4 sm:$0xff]   ;;  %v1255_v31 = vld [vmem:[#allocation5 + $0xf4] ss:$8 sps:$4 sm:$0xff]  }
  0x31   :  { %699 = vmatprep.subr.bf16.mxu0 %v1225_v11  ;;  %739 = vmatpush1.bf16.msra.mxu1 %v1224_v12  ;;  %v1254_v32 = vld [vmem:[#allocation5 + $0x100] ss:$8 sps:$4 sm:$0xff]   ;;  %v1258_v33 = vld [vmem:[#allocation5 + $0x1f4] ss:$8 sps:$4 sm:$0xff]   ;;  %v1257_v34 = vld [vmem:[#allocation5 + $0xf0] ss:$8 sps:$4 sm:$0xff]  }
  0x32   :  { %740 = vmatprep.subr.bf16.mxu1 %v1228_v13  ;;  %v1261_v35 = vld [vmem:[#allocation5 + $0xe4] ss:$8 sps:$4 sm:$0xff]   ;;  %v1260_v36 = vld [vmem:[#allocation5 + $0x1f0] ss:$8 sps:$4 sm:$0xff]   ;;  %v1263_v38 = vld [vmem:[#allocation5 + $0xe0] ss:$8 sps:$4 sm:$0xff]  }
  0x33   :  { %v1264_v37 = vld [vmem:[#allocation5 + $0x1e4] ss:$8 sps:$4 sm:$0xff]   ;;  %v1267_v39 = vld [vmem:[#allocation5 + $0xd4] ss:$8 sps:$4 sm:$0xff]   ;;  %v1266_v40 = vld [vmem:[#allocation5 + $0x1e0] ss:$8 sps:$4 sm:$0xff]  }
  0x34   :  { %700 = vmatpush1.bf16.msra.mxu0 %v1227_v14  ;;  %v1270_v41 = vld [vmem:[#allocation5 + $0x1d4] ss:$8 sps:$4 sm:$0xff]   ;;  %v1269_v42 = vld [vmem:[#allocation5 + $0xd0] ss:$8 sps:$4 sm:$0xff]   ;;  %v1273_v43 = vld [vmem:[#allocation5 + $0xc4] ss:$8 sps:$4 sm:$0xff]  }
  0x35   :  { %701 = vmatprep.subr.bf16.mxu0 %v1231_v15  ;;  %741 = vmatpush1.bf16.msra.mxu1 %v1230_v16  ;;  %v1272_v44 = vld [vmem:[#allocation5 + $0x1d0] ss:$8 sps:$4 sm:$0xff]   ;;  %v1276_v45 = vld [vmem:[#allocation5 + $0x1c4] ss:$8 sps:$4 sm:$0xff]   ;;  %v1275_v47 = vld [vmem:[#allocation5 + $0xc0] ss:$8 sps:$4 sm:$0xff]  }
  0x36   :  { %742 = vmatprep.subr.bf16.mxu1 %v1234_v17  ;;  %v61_v46 = vld [vmem:[#allocation2] sm:$0xff]  ;;  %v1279_v49 = vld [vmem:[#allocation5 + $0xb4] ss:$8 sps:$4 sm:$0xff]   ;;  %v62_v50 = vld [vmem:[#allocation2 + $0x8] sm:$0xff]  ;;  %vm689_vm0 = vcmask 130048   ;;  %v1470_v16 = vmov 0  }
  0x37   :  { %v1054_v48 = vcombine.high %v61_v46, %v61_v46  ;;  %v1278_v51 = vld [vmem:[#allocation5 + $0x1c0] ss:$8 sps:$4 sm:$0xff]   ;;  %v1056_v52 = vcombine.high %v62_v50, %v62_v50  ;;  %v1282_v53 = vld [vmem:[#allocation5 + $0x1b4] ss:$8 sps:$4 sm:$0xff]   ;;  %v1281_v54 = vld [vmem:[#allocation5 + $0xb0] ss:$8 sps:$4 sm:$0xff]   ;;  %v1053_v5 = vcombine.low %v61_v46, %v61_v46  ;;  %v1055_v7 = vcombine.low %v62_v50, %v62_v50 }
  0x38   :  { %702 = vmatpush1.bf16.msra.mxu0 %v1233_v18  ;;  %v1285_v55 = vld [vmem:[#allocation5 + $0xa4] ss:$8 sps:$4 sm:$0xff]   ;;  %v1284_v56 = vld [vmem:[#allocation5 + $0x1b0] ss:$8 sps:$4 sm:$0xff]   ;;  %v1287_v58 = vld [vmem:[#allocation5 + $0xa0] ss:$8 sps:$4 sm:$0xff]  }
  0x39   :  { %703 = vmatprep.subr.bf16.mxu0 %v1237_v19  ;;  %743 = vmatpush1.bf16.msra.mxu1 %v1236_v20  ;;  %v1288_v57 = vld [vmem:[#allocation5 + $0x1a4] ss:$8 sps:$4 sm:$0xff]   ;;  %v1291_v59 = vld [vmem:[#allocation5 + $0x94] ss:$8 sps:$4 sm:$0xff]   ;;  %v1290_v60 = vld [vmem:[#allocation5 + $0x1a0] ss:$8 sps:$4 sm:$0xff]  }
  0x3a   :  { %744 = vmatprep.subr.bf16.mxu1 %v1240_v21  ;;  %725 = vmatprep.mubr.bf16.mxu0 %v1054_v48  ;;  %v1294_v61 = vld [vmem:[#allocation5 + $0x194] ss:$8 sps:$4 sm:$0xff]   ;;  %v1293_v62 = vld [vmem:[#allocation5 + $0x90] ss:$8 sps:$4 sm:$0xff]   ;;  %v1297_v63 = vld [vmem:[#allocation5 + $0x84] ss:$8 sps:$4 sm:$0xff]  }
  0x3b   :  { %766 = vmatprep.mubr.bf16.mxu1 %v1056_v52  ;;  %v1296_v0 = vld [vmem:[#allocation5 + $0x190] ss:$8 sps:$4 sm:$0xff]   ;;  %v1300_v1 = vld [vmem:[#allocation5 + $0x184] ss:$8 sps:$4 sm:$0xff]   ;;  %v1299_v2 = vld [vmem:[#allocation5 + $0x80] ss:$8 sps:$4 sm:$0xff]  }
  0x3c   :  { %704 = vmatpush1.bf16.msra.mxu0 %v1239_v22  ;;  %v1307_v3 = vld [vmem:[#allocation5 + $0x274] ss:$8 sps:$4 sm:$0xff]   ;;  %v1304_v4 = vld [vmem:[#allocation5 + $0x180] ss:$8 sps:$4 sm:$0xff]   ;;  %v1305_v6 = vld [vmem:[#allocation5 + $0x270] ss:$8 sps:$4 sm:$0xff]  }
  0x3d   :  { %705 = vmatprep.subr.bf16.mxu0 %v1243_v23  ;;  %745 = vmatpush1.bf16.msra.mxu1 %v1242_v24  ;;  %v1312_v8 = vld [vmem:[#allocation5 + $0x264] ss:$8 sps:$4 sm:$0xff]   ;;  %v1352_v10 = vld [vmem:[#allocation5 + $0x300] ss:$8 sps:$4 sm:$0xff]   ;;  %v1511_v12 = vld [vmem:[#allocation2 + $0x10] sm:$0xff]  ;;  %s1471_s12 = smov [#allocation8]  }
  0x3e   :  { %746 = vmatprep.subr.bf16.mxu1 %v1246_v25  ;;  %v1354_v9 = vld [vmem:[#allocation5 + $0x304] ss:$8 sps:$4 sm:$0xff]   ;;  %v1310_v11 = vld [vmem:[#allocation5 + $0x260] ss:$8 sps:$4 sm:$0xff]   ;;  %v1315_v13 = vld [vmem:[#allocation5 + $0x254] ss:$8 sps:$4 sm:$0xff]   ;;  %v1058_v14 = vcombine.high %v1511_v12, %v1511_v12 }
  0x3f   :  { %v1313_v15 = vld [vmem:[#allocation5 + $0x250] ss:$8 sps:$4 sm:$0xff]   ;;  %v1318_v17 = vld [vmem:[#allocation5 + $0x244] ss:$8 sps:$4 sm:$0xff]   ;;  %v1358_v18 = vld [vmem:[#allocation2 + $0x18] ss:$0 sps:$4 sm:$0xff]  }
  0x40   :  { %706 = vmatpush1.bf16.msra.mxu0 %v1245_v26  ;;  %v1316_v19 = vld [vmem:[#allocation5 + $0x240] ss:$8 sps:$4 sm:$0xff]   ;;  %v1321_v20 = vld [vmem:[#allocation5 + $0x234] ss:$8 sps:$4 sm:$0xff]   ;;  %v1319_v21 = vld [vmem:[#allocation5 + $0x230] ss:$8 sps:$4 sm:$0xff]  }
  0x41   :  { %707 = vmatprep.subr.bf16.mxu0 %v1249_v27  ;;  %747 = vmatpush1.bf16.msra.mxu1 %v1248_v28  ;;  %v1324_v22 = vld [vmem:[#allocation5 + $0x224] ss:$8 sps:$4 sm:$0xff]   ;;  %v1322_v23 = vld [vmem:[#allocation5 + $0x220] ss:$8 sps:$4 sm:$0xff]   ;;  %v1327_v24 = vld [vmem:[#allocation5 + $0x214] ss:$8 sps:$4 sm:$0xff]  }
  0x42   :  { %748 = vmatprep.subr.bf16.mxu1 %v1252_v29  ;;  %v1325_v25 = vld [vmem:[#allocation5 + $0x210] ss:$8 sps:$4 sm:$0xff]   ;;  %v1330_v26 = vld [vmem:[#allocation5 + $0x204] ss:$8 sps:$4 sm:$0xff]   ;;  %v1328_v27 = vld [vmem:[#allocation5 + $0x200] ss:$8 sps:$4 sm:$0xff]  }
  0x43   :  { %v1333_v28 = vld [vmem:[#allocation5 + $0x2f4] ss:$8 sps:$4 sm:$0xff]   ;;  %v1331_v29 = vld [vmem:[#allocation5 + $0x2f0] ss:$8 sps:$4 sm:$0xff]   ;;  %v1362_v46 = vld [vmem:[#allocation7 + $0x38] sm:$0xff]   ;;  %s1043_s13 = sshll.u32 %s1471_s12, 4  ;;  %s1044_s13 = int_to_ptr.vmem [resolvable:$true] %s1043_s13 }
  0x44   :  { %708 = vmatpush1.bf16.msra.mxu0 %v1251_v30  ;;  %v1336_v30 = vld [vmem:[#allocation5 + $0x2e4] ss:$8 sps:$4 sm:$0xff]   ;;  %v1366_v50 = vld [vmem:[#allocation7 + $0x28] sm:$0xff]   ;;  %v1368_v52 = vld [vmem:[#allocation7 + $0x20] sm:$0xff]   ;;  %s1437_s14 = scalar_lea.vmem %s1044_s13, 128  ;;  %p1442_p2 = scmp.lt.s32.totalorder %s1044_s13, %s1044_s13 }
  0x45   :  { %709 = vmatprep.subr.bf16.mxu0 %v1255_v31  ;;  %749 = vmatpush1.bf16.msra.mxu1 %v1254_v32  ;;  %v1334_v31 = vld [vmem:[#allocation5 + $0x2e0] ss:$8 sps:$4 sm:$0xff]   ;;  %v1339_v32 = vld [vmem:[#allocation5 + $0x2d4] ss:$8 sps:$4 sm:$0xff]   ;;  %p1438_p1 = scmp.ne.s32.totalorder %s1044_s13, %s1437_s14  ;;  %p1443_p3 = scmp.lt.s32.totalorder %s1437_s14, %s1437_s14 }
  0x46   :  { %750 = vmatprep.subr.bf16.mxu1 %v1258_v33  ;;  %v1337_v33 = vld [vmem:[#allocation5 + $0x2d0] ss:$8 sps:$4 sm:$0xff]   ;;  %v1364_v48 = vld [vmem:[#allocation7 + $0x30] sm:$0xff]  }
  0x47   :  { %p1444_p4 = por %p1443_p3, %p1442_p2 }
  0x48   :  { %710 = vmatpush2.bf16.msra.mxu0 %v1257_v34  ;;  %v1342_v34 = vld [vmem:[#allocation5 + $0x2c4] ss:$8 sps:$4 sm:$0xff]  }
  0x49   :  { %711 = vmatprep.subr.bf16.mxu0 %v1261_v35  ;;  %751 = vmatpush2.bf16.msra.mxu1 %v1260_v36  ;;  %v1340_v35 = vld [vmem:[#allocation5 + $0x2c0] ss:$8 sps:$4 sm:$0xff]   ;;  %v1345_v36 = vld [vmem:[#allocation5 + $0x2b4] ss:$8 sps:$4 sm:$0xff]   ;;  %p1445_p5 = pnand %p1444_p4, %p1438_p1 }
  0x4a   :  { %752 = vmatprep.subr.bf16.mxu1 %v1264_v37  ;;  %v1343_v37 = vld [vmem:[#allocation5 + $0x2b0] ss:$8 sps:$4 sm:$0xff]  }
  0x4c   :  { %712 = vmatpush2.bf16.msra.mxu0 %v1263_v38  ;;  %v1348_v38 = vld [vmem:[#allocation5 + $0x2a4] ss:$8 sps:$4 sm:$0xff]  }
  0x4d   :  { %713 = vmatprep.subr.bf16.mxu0 %v1267_v39  ;;  %753 = vmatpush2.bf16.msra.mxu1 %v1266_v40  ;;  %v1346_v39 = vld [vmem:[#allocation5 + $0x2a0] ss:$8 sps:$4 sm:$0xff]   ;;  %v1351_v40 = vld [vmem:[#allocation5 + $0x294] ss:$8 sps:$4 sm:$0xff]  }
  0x4e   :  { %754 = vmatprep.subr.bf16.mxu1 %v1270_v41  ;;  %v1349_v41 = vld [vmem:[#allocation5 + $0x290] ss:$8 sps:$4 sm:$0xff]  }
  0x50   :  { %714 = vmatpush2.bf16.msra.mxu0 %v1269_v42  ;;  %v1357_v42 = vld [vmem:[#allocation5 + $0x284] ss:$8 sps:$4 sm:$0xff]  }
  0x51   :  { %715 = vmatprep.subr.bf16.mxu0 %v1273_v43  ;;  %755 = vmatpush2.bf16.msra.mxu1 %v1272_v44  ;;  %v1355_v43 = vld [vmem:[#allocation5 + $0x280] ss:$8 sps:$4 sm:$0xff]   ;;  %v1057_v44 = vcombine.low %v1511_v12, %v1511_v12  ;;  %v163_v12 = vld [vmem:[%s1529_s2] sm:$0x3] }
  0x52   :  { %756 = vmatprep.subr.bf16.mxu1 %v1276_v45  ;;  %v1361_v45 = vld [vmem:[#allocation7 + $0x78] sm:$0xff]  }
  0x54   :  { %716 = vmatpush2.bf16.msra.mxu0 %v1275_v47  ;;  %v1363_v47 = vld [vmem:[#allocation7 + $0x70] sm:$0xff]  }
  0x55   :  { %717 = vmatprep.subr.bf16.mxu0 %v1279_v49  ;;  %757 = vmatpush2.bf16.msra.mxu1 %v1278_v51  ;;  %v1365_v49 = vld [vmem:[#allocation7 + $0x68] sm:$0xff]   ;;  %v1367_v51 = vld [vmem:[#allocation7 + $0x60] sm:$0xff]  }
  0x56   :  { %758 = vmatprep.subr.bf16.mxu1 %v1282_v53  ;;  %v1369_v53 = vld [vmem:[#allocation7 + $0x58] sm:$0xff]  }
  0x58   :  { %718 = vmatpush2.bf16.msra.mxu0 %v1281_v54  ;;  %v1370_v54 = vld [vmem:[#allocation7 + $0x18] sm:$0xff]  }
  0x59   :  { %719 = vmatprep.subr.bf16.mxu0 %v1285_v55  ;;  %759 = vmatpush2.bf16.msra.mxu1 %v1284_v56  ;;  %v1371_v55 = vld [vmem:[#allocation7 + $0x50] sm:$0xff]  }
  0x5a   :  { %760 = vmatprep.subr.bf16.mxu1 %v1288_v57  ;;  %v1372_v56 = vld [vmem:[#allocation7 + $0x10] sm:$0xff]   ;;  %v1373_v57 = vld [vmem:[#allocation7 + $0x48] sm:$0xff]  }
  0x5c   :  { %720 = vmatpush2.bf16.msra.mxu0 %v1287_v58  ;;  %v1374_v58 = vld [vmem:[#allocation7 + $0x8] sm:$0xff]  }
  0x5d   :  { %721 = vmatprep.subr.bf16.mxu0 %v1291_v59  ;;  %761 = vmatpush2.bf16.msra.mxu1 %v1290_v60  ;;  %v1375_v59 = vld [vmem:[#allocation7 + $0x40] sm:$0xff]  }
  0x5e   :  { %762 = vmatprep.subr.bf16.mxu1 %v1294_v61  ;;  %v1376_v60 = vld [vmem:[#allocation7] sm:$0xff]  }
  0x60   :  { %722 = vmatpush2.bf16.msra.mxu0 %v1293_v62 }
  0x61   :  { %723 = vmatprep.subr.bf16.mxu0 %v1297_v63  ;;  %763 = vmatpush2.bf16.msra.mxu1 %v1296_v0 }
  0x62   :  { %764 = vmatprep.subr.bf16.mxu1 %v1300_v1 }
  0x64   :  { %724 = vmatpush2.bf16.msra.mxu0 %v1299_v2 }
  0x65   :  { %775 = vmatprep.subr.bf16.mxu0 %v1307_v3  ;;  %765 = vmatpush2.bf16.msra.mxu1 %v1304_v4 }
  0x66   :  { %830 = vmatprep.subr.bf16.mxu1 %v1354_v9  ;;  %v165_v9 = vlaneseq }
  0x67   :  { %726 = vmatmul.mubr.bf16.vlgmr.msra.gmra.mxu0 %v1053_v5 }
  0x68   :  { %776 = vmatpush1.bf16.msra.mxu0 %v1305_v6  ;;  %767 = vmatmul.mubr.bf16.vlgmr.msra.gmra.mxu1 %v1055_v7 }
  0x69   :  { %777 = vmatprep.subr.bf16.mxu0 %v1312_v8  ;;  %831 = vmatpush1.bf16.msra.mxu1 %v1352_v10  ;;  %v166_v10 = vshrl.u32 %v165_v9, 7 }
  0x6a   :  { %848 = vmatprep.mubr.bf16.mxu1 %v1470_v16  ;;  %807 = vmatprep.mubr.bf16.mxu0 %v1058_v14 }
  0x6b   :  { %1176 = vmatprep.subr.bf16.mxu1 %v1361_v45 }
  0x6c   :  { %778 = vmatpush1.bf16.msra.mxu0 %v1310_v11  ;;  %v167_v11 = vsub.s32 0, %v166_v10 }
  0x6d   :  { %779 = vmatprep.subr.bf16.mxu0 %v1315_v13  ;;  %v171_v13 = vsub.s32 1, %v166_v10 }
  0x6e   :  { %v168_v14 = vrot.slane %v163_v12, %v167_v11 }
  0x70   :  { %780 = vmatpush1.bf16.msra.mxu0 %v1313_v15  ;;  %1158 = vmatmul.mubr.msk.bf16.vlgmr.msra.gmra.mxu1 %vm689_vm0, %v1358_v18  ;;  %v172_v15 = vrot.slane %v163_v12, %v171_v13 }
  0x71   :  { %781 = vmatprep.subr.bf16.mxu0 %v1318_v17  ;;  %1177 = vmatpush3.bf16.msra.mxu1 %v1362_v46 }
  0x72   :  { %1178 = vmatprep.subr.bf16.mxu1 %v1363_v47 }
  0x74   :  { %782 = vmatpush1.bf16.msra.mxu0 %v1316_v19 }
  0x75   :  { %783 = vmatprep.subr.bf16.mxu0 %v1321_v20  ;;  %1179 = vmatpush3.bf16.msra.mxu1 %v1364_v48 }
  0x76   :  { %1180 = vmatprep.subr.bf16.mxu1 %v1365_v49 }
  0x78   :  { %784 = vmatpush1.bf16.msra.mxu0 %v1319_v21 }
  0x79   :  { %785 = vmatprep.subr.bf16.mxu0 %v1324_v22  ;;  %1181 = vmatpush3.bf16.msra.mxu1 %v1366_v50 }
  0x7a   :  { %1182 = vmatprep.subr.bf16.mxu1 %v1367_v51 }
  0x7c   :  { %786 = vmatpush1.bf16.msra.mxu0 %v1322_v23 }
  0x7d   :  { %787 = vmatprep.subr.bf16.mxu0 %v1327_v24  ;;  %1183 = vmatpush3.bf16.msra.mxu1 %v1368_v52 }
  0x7e   :  { %1184 = vmatprep.subr.bf16.mxu1 %v1369_v53 }
  0x80   :  { %788 = vmatpush1.bf16.msra.mxu0 %v1325_v25 }
  0x81   :  { %789 = vmatprep.subr.bf16.mxu0 %v1330_v26  ;;  %1185 = vmatpush3.bf16.msra.mxu1 %v1370_v54 }
  0x82   :  { %1186 = vmatprep.subr.bf16.mxu1 %v1371_v55 }
  0x84   :  { %790 = vmatpush1.bf16.msra.mxu0 %v1328_v27 }
  0x85   :  { %791 = vmatprep.subr.bf16.mxu0 %v1333_v28  ;;  %1187 = vmatpush3.bf16.msra.mxu1 %v1372_v56 }
  0x86   :  { %1188 = vmatprep.subr.bf16.mxu1 %v1373_v57 }
  0x88   :  { %792 = vmatpush2.bf16.msra.mxu0 %v1331_v29 }
  0x89   :  { %793 = vmatprep.subr.bf16.mxu0 %v1336_v30  ;;  %1189 = vmatpush3.bf16.msra.mxu1 %v1374_v58 }
  0x8a   :  { %1190 = vmatprep.subr.bf16.mxu1 %v1375_v59 }
  0x8c   :  { %794 = vmatpush2.bf16.msra.mxu0 %v1334_v31 }
  0x8d   :  { %795 = vmatprep.subr.bf16.mxu0 %v1339_v32  ;;  %1191 = vmatpush3.bf16.msra.mxu1 %v1376_v60 }
  0x90   :  { %796 = vmatpush2.bf16.msra.mxu0 %v1337_v33  ;;  %v1159_v33 = vld [vmem:[%s1531_s4] ss:$0 sm:$0xff] }
  0x91   :  { %797 = vmatprep.subr.bf16.mxu0 %v1342_v34 }
  0x94   :  { %798 = vmatpush2.bf16.msra.mxu0 %v1340_v35 }
  0x95   :  { %799 = vmatprep.subr.bf16.mxu0 %v1345_v36 }
  0x98   :  { %800 = vmatpush2.bf16.msra.mxu0 %v1343_v37 }
  0x99   :  { %801 = vmatprep.subr.bf16.mxu0 %v1348_v38 }
  0x9c   :  { %802 = vmatpush2.bf16.msra.mxu0 %v1346_v39 }
  0x9d   :  { %803 = vmatprep.subr.bf16.mxu0 %v1351_v40 }
  0xa0   :  { %804 = vmatpush2.bf16.msra.mxu0 %v1349_v41 }
  0xa1   :  { %805 = vmatprep.subr.bf16.mxu0 %v1357_v42 }
  0xa4   :  { %806 = vmatpush2.bf16.msra.mxu0 %v1355_v43 }
  0xa7   :  { %808 = vmatmul.mubr.bf16.vlgmr.msra.gmra.mxu0 %v1057_v44 }
 0x127   :  { %v727_v61 = vpop.f32.mrf.mxu0 }
 0x128   :  { %v768_v63 = vpop.f32.mrf.mxu1  ;;  %v728_v16 = vadd.f32 %v727_v61, %v168_v14 }
 0x129   :  { %v729_v62 = vpop.f32.mrf.mxu0 }
 0x12a   :  { %v770_v1 = vpop.f32.mrf.mxu1  ;;  %v730_v17 = vadd.f32 %v729_v62, %v172_v15  ;;  %v769_v18 = vadd.f32 %v768_v63, %v728_v16 }
 0x12b   :  { %v731_v0 = vpop.f32.mrf.mxu0 }
 0x12c   :  { %v772_v3 = vpop.f32.mrf.mxu1  ;;  %v771_v20 = vadd.f32 %v770_v1, %v730_v17 }
 0x12d   :  { %v732_v2 = vpop.f32.mrf.mxu0 }
 0x12e   :  { %v773_v4 = vpop.f32.mrf.mxu1 }
 0x130   :  { %v850_v5 = vpop.f32.mrf.mxu1 }
 0x132   :  { %v852_v6 = vpop.f32.mrf.mxu1 }
 0x134   :  { %v854_v7 = vpop.f32.mrf.mxu1 }
 0x136   :  { %v855_v8 = vpop.f32.mrf.mxu1 }
 0x167   :  { %v809_v19 = vpop.f32.mrf.mxu0 }
 0x168   :  { %v810_v21 = vadd.f32 %v809_v19, %v769_v18 }
 0x169   :  { %v811_v22 = vpop.f32.mrf.mxu0 }
 0x16a   :  { %v851_v23 = vadd.f32 %v850_v5, %v810_v21  ;;  %v812_v24 = vadd.f32 %v811_v22, %v771_v20 }
 0x16b   :  { %v813_v25 = vpop.f32.mrf.mxu0 }
 0x16c   :  { %v853_v26 = vadd.f32 %v852_v6, %v812_v24  ;;  %v857_v27 = vmax.f32 %v851_v23, 0.0 }
 0x16d   :  { %v814_v28 = vpop.f32.mrf.mxu0 }
 0x16e   :  { %v858_v29 = vmax.f32 %v853_v26, 0.0  ;;  %v859_v31 = vpack.c.bf16 %v857_v27, %v857_v27 }
 0x170   :  { %v860_v30 = vpack.c.bf16 %v858_v29, %v858_v29 }
 0x172   :  { %1028 = vmatprep.mubr.bf16.mxu1 %v860_v30 }
 0x173   :  { %1029 = vmatmul.mubr.bf16.vlgmr.msra.gmra.mxu1 %v859_v31 }
 0x233   :  { %v1192_v32 = vpop.f32.mrf.mxu1 }
 0x235   :  { %v1193_v34 = vpop.f32.mrf.mxu1 }
 0x236   :  { %v1194_v35 = vadd.f32 %v1193_v34, %v1192_v32 }
 0x237   :  { %v1195_v36 = vpop.f32.mrf.mxu1 }
 0x238   :  { %v1031_v37 = vadd.f32 %v1194_v35, %v1159_v33 }
 0x239   :  { %v1196_v38 = vpop.f32.mrf.mxu1 }
 0x23a   :  { %1036 = vst [vmem:[#allocation8] sm:$0xff] %v1031_v37 }
 0x23b   :  { %1448 = shalt.err (!%p1445_p5)
}
 0x23c   :  { %1046 = dma.vmem_to_hbm [thread:$0]  %s1044_s13, 128, %s1532_s5, [#allocation4]  }
 0x23d   :  { %1461 = dma.done.wait [#allocation4], 128  }
 0x23e   :  { %1462 = vsyncadd [#allocation4], 4294967168 }
 0x23f   :  { %1050 = vsyncpa [#allocation3], 1 }
 0x240   :  { %1051 = vsyncpa [#allocation6], 1 }
 0x241   :  { %1052 = vsyncpa [#allocation4], 1 }

</bundles_post_ra>
